<compile_context>
chip_gen: v7x
topology: tpu7x:2x2x1
jax: 0.10.0
libtpu: 0.0.40
codegen_flags: <defaults>
</compile_context>

<pallas_src>
import functools

import jax
import jax.numpy as jnp
from jax.experimental import pallas as pl
from jax.experimental.pallas import tpu as pltpu

BN_EPS = 1e-5          # torch.nn.BatchNorm1d default eps
LEAKY_SLOPE = 0.01     # torch.nn.LeakyReLU default negative_slope
LANE = 128             # TPU lane width


def _round_up(x, m):
    return (x + m - 1) // m * m


def _pick_tm(n):
    """Largest batch tile in {1024,512,256} that keeps >=2 grid steps (v7x TC
    sharding), else 128 (or smaller for tiny batches)."""
    for tm in (1024, 512, 256):
        if pl.cdiv(n, tm) >= 2:
            return tm
    return min(128, _round_up(max(n, 1), 8))


# --------------------------------------------------------------------------- #
# Kernel
# --------------------------------------------------------------------------- #
def input_network_kernel(x_ref, w1, b1, w2, b2, w3, b3, o_ref):
    # x_ref: (tm, input_dim) f32 tile (contraction dim unpadded).
    # w*: BN-folded, pre-transposed [in, out] bf16, output dims padded to 128.
    # b*: f32 [1, out_pad] rows.
    h = x_ref[...]
    for w_ref, b_ref in ((w1, b1), (w2, b2), (w3, b3)):
        h = jnp.dot(h.astype(w_ref.dtype), w_ref[...],
                    preferred_element_type=jnp.float32) + b_ref[...]
        h = jnp.where(h > 0, h, LEAKY_SLOPE * h)          # LeakyReLU in f32
        # TODO(synk): Dropout(p=0.5) is the identity in eval mode; training-mode
        # dropout would need pltpu.prng_seed / pltpu.prng_random_bits here.
    o_ref[...] = h.astype(o_ref.dtype)


# --------------------------------------------------------------------------- #
# Host-side parameter folding / padding
# --------------------------------------------------------------------------- #
def fold_bn_and_pad(params, matmul_dtype):
    """Fold eval-mode BatchNorm into (W, b); pad output dims to 128 lanes.

    Layer 1 keeps its contraction (input) dim unpadded so the x HBM read stays
    at the true width; layers 2/3 pad K up to the previous layer's padded
    output so in-kernel activations stay lane-dense (padded lanes are exact 0).
    """
    folded = []
    k_pad = None
    for i in (1, 2, 3):
        w, b = params[f"w{i}"], params[f"b{i}"]
        g, beta = params[f"g{i}"], params[f"beta{i}"]
        mean, var = params[f"mean{i}"], params[f"var{i}"]
        scale = g * jax.lax.rsqrt(var + BN_EPS)                  # [1, out]
        w_f = w * scale                                          # fold into columns
        b_f = (b - mean) * scale + beta                          # [1, out]
        fin, fout = w.shape
        fin_p = fin if k_pad is None else k_pad
        fout_p = _round_up(fout, LANE)
        w_p = jnp.zeros((fin_p, fout_p), jnp.float32).at[:fin, :fout].set(w_f)
        b_p = jnp.zeros((1, fout_p), jnp.float32).at[:, :fout].set(b_f)
        folded.append((w_p.astype(matmul_dtype), b_p))
        k_pad = fout_p
    return folded


# --------------------------------------------------------------------------- #
# Wrapper
# --------------------------------------------------------------------------- #
@functools.partial(jax.jit, static_argnames=("tm", "matmul_dtype", "out_dtype"))
def input_network(x, params, *, tm=None, matmul_dtype=jnp.bfloat16,
                  out_dtype=jnp.bfloat16):
    """x: [N, input_dim] float32 -> [N, hidden_dim] (bf16 by default)."""
    n, input_dim = x.shape
    h1 = params["w1"].shape[1]
    h2 = params["w2"].shape[1]
    hidden_dim = params["w3"].shape[1]

    (w1, b1), (w2, b2), (w3, b3) = fold_bn_and_pad(params, matmul_dtype)
    out_p = w3.shape[1]

    if tm is None:
        tm = _pick_tm(n)
    grid = (pl.cdiv(n, tm),)   # last tile's OOB rows are recomputed + masked

    resident = lambda arr: pl.BlockSpec(arr.shape, lambda i: (0, 0))
    in_specs = [
        pl.BlockSpec((tm, input_dim), lambda i: (i, 0)),   # x tile, pipelined
        resident(w1), resident(b1),
        resident(w2), resident(b2),
        resident(w3), resident(b3),
    ]
    out_specs = pl.BlockSpec((tm, out_p), lambda i: (i, 0))

    # True (unpadded) FLOPs; bytes reflect f32 x in, bf16 weights, bf16 out.
    flops = 2 * n * (input_dim * h1 + h1 * h2 + h2 * hidden_dim)
    bytes_accessed = (
        n * input_dim * x.dtype.itemsize
        + sum(w.size * w.dtype.itemsize + b.size * b.dtype.itemsize
              for w, b in ((w1, b1), (w2, b2), (w3, b3)))
        + n * out_p * jnp.dtype(out_dtype).itemsize)

    out = pl.pallas_call(
        input_network_kernel,
        out_shape=jax.ShapeDtypeStruct((n, out_p), out_dtype),
        grid=grid,
        in_specs=in_specs,
        out_specs=out_specs,
        compiler_params=pltpu.CompilerParams(
            dimension_semantics=("parallel",)),        # shards batch across TCs
        cost_estimate=pl.CostEstimate(
            flops=flops, transcendentals=0, bytes_accessed=bytes_accessed),
    )(x, w1, b1, w2, b2, w3, b3)

    # Feature slice back to the true hidden_dim (bf16 -> half the bytes of f32).
    return out[:, :hidden_dim]


# --------------------------------------------------------------------------- #
# Test harness
# --------------------------------------------------------------------------- #
def make_params(key, input_dim, hidden_dim):
    """Deterministic synthetic parameters matching nn.Linear/BatchNorm1d shapes."""
    h1 = hidden_dim // 3
    h2 = hidden_dim * 2 // 3
    dims = [(input_dim, h1), (h1, h2), (h2, hidden_dim)]
    params = {}
    keys = jax.random.split(key, 6 * len(dims))
    for i, (fan_in, fan_out) in enumerate(dims):
        kw, kb, kg, kbe, km, kv = keys[6 * i: 6 * i + 6]
        bound = 1.0 / jnp.sqrt(fan_in)
        idx = i + 1
        params[f"w{idx}"] = jax.random.uniform(kw, (fan_in, fan_out), jnp.float32, -bound, bound)
        params[f"b{idx}"] = jax.random.uniform(kb, (1, fan_out), jnp.float32, -bound, bound)
        params[f"g{idx}"] = jax.random.uniform(kg, (1, fan_out), jnp.float32, 0.5, 1.5)
        params[f"beta{idx}"] = 0.1 * jax.random.normal(kbe, (1, fan_out), jnp.float32)
        params[f"mean{idx}"] = 0.1 * jax.random.normal(km, (1, fan_out), jnp.float32)
        params[f"var{idx}"] = jax.random.uniform(kv, (1, fan_out), jnp.float32, 0.5, 1.5)
    return params


def input_network_ref(x, params, matmul_dtype=jnp.float32):
    """Pure-JAX reference (same BN fold; optional bf16 matmul-input cast)."""
    h = x
    for i in (1, 2, 3):
        scale = params[f"g{i}"] * jax.lax.rsqrt(params[f"var{i}"] + BN_EPS)
        w_f = (params[f"w{i}"] * scale).astype(matmul_dtype)
        b_f = (params[f"b{i}"] - params[f"mean{i}"]) * scale + params[f"beta{i}"]
        h = jnp.dot(h.astype(matmul_dtype), w_f,
                    preferred_element_type=jnp.float32) + b_f
        h = jnp.where(h > 0, h, LEAKY_SLOPE * h)
    return h


if __name__ == "__main__":
    input_dim, hidden_dim, batch = 32, 48, 200   # tm=128 -> grid=(2,): both v7x TCs
    key = jax.random.PRNGKey(0)
    kx, kp = jax.random.split(key)
    x = jax.random.normal(kx, (batch, input_dim), jnp.float32)
    params = make_params(kp, input_dim, hidden_dim)

    out = jax.block_until_ready(input_network(x, params))
    out_f32 = out.astype(jnp.float32)

    ref_bf16 = input_network_ref(x, params, matmul_dtype=jnp.bfloat16)  # same cast path
    ref_f32 = input_network_ref(x, params, matmul_dtype=jnp.float32)    # full-precision sanity

    assert out.shape == (batch, hidden_dim)
    assert out.dtype == jnp.bfloat16
    assert jnp.allclose(out_f32, ref_bf16, atol=2e-2, rtol=2e-2)
    assert jnp.allclose(out_f32, ref_f32, atol=1e-1, rtol=1e-1)
    print("KERNEL_OK")
</pallas_src>

<mosaic_0001>
module attributes {stable_mosaic.version = 11 : i64} {
  func.func @input_network_kernel(%arg0: i32, %arg1: memref<128x32xf32, #tpu.memory_space<vmem>>, %arg2: memref<32x128xbf16, #tpu.memory_space<vmem>>, %arg3: memref<1x128xf32, #tpu.memory_space<vmem>>, %arg4: memref<128x128xbf16, #tpu.memory_space<vmem>>, %arg5: memref<1x128xf32, #tpu.memory_space<vmem>>, %arg6: memref<128x128xbf16, #tpu.memory_space<vmem>>, %arg7: memref<1x128xf32, #tpu.memory_space<vmem>>, %arg8: memref<128x128xbf16, #tpu.memory_space<vmem>>) attributes {dimension_semantics = [#tpu.dimension_semantics<parallel>], iteration_bounds = array<i64: 2>, scalar_prefetch = 0 : i64, scratch_operands = 0 : i64, tpu.core_type = #tpu.core_type<tc>, window_params = [{transform_indices = @transform_0, window_bounds = array<i64: 128, 32>}, {pipeline_mode = #tpu.pipeline_mode<synchronous>, transform_indices = @transform_1, window_bounds = array<i64: 32, 128>}, {pipeline_mode = #tpu.pipeline_mode<synchronous>, transform_indices = @transform_2, window_bounds = array<i64: 1, 128>}, {pipeline_mode = #tpu.pipeline_mode<synchronous>, transform_indices = @transform_3, window_bounds = array<i64: 128, 128>}, {pipeline_mode = #tpu.pipeline_mode<synchronous>, transform_indices = @transform_4, window_bounds = array<i64: 1, 128>}, {pipeline_mode = #tpu.pipeline_mode<synchronous>, transform_indices = @transform_5, window_bounds = array<i64: 128, 128>}, {pipeline_mode = #tpu.pipeline_mode<synchronous>, transform_indices = @transform_6, window_bounds = array<i64: 1, 128>}, {transform_indices = @transform_7, window_bounds = array<i64: 128, 128>}]} {
    %c0 = arith.constant 0 : index
    %c0_0 = arith.constant 0 : index
    %0 = vector.load %arg1[%c0, %c0_0] : memref<128x32xf32, #tpu.memory_space<vmem>>, vector<128x32xf32>
    %1 = arith.truncf %0 : vector<128x32xf32> to vector<128x32xbf16>
    %c0_1 = arith.constant 0 : index
    %c0_2 = arith.constant 0 : index
    %2 = vector.load %arg2[%c0_1, %c0_2] : memref<32x128xbf16, #tpu.memory_space<vmem>>, vector<32x128xbf16>
    %cst = arith.constant dense<0.000000e+00> : vector<128x128xf32>
    %3 = tpu.matmul %1, %2, %cst {dimension_numbers = #tpu.dot_dimension_numbers<[1], [0], [0], [1], [0, 0, 1, 1], [], []>} : vector<128x32xbf16>, vector<32x128xbf16>, vector<128x128xf32> -> vector<128x128xf32>
    %c0_3 = arith.constant 0 : index
    %c0_4 = arith.constant 0 : index
    %4 = vector.load %arg3[%c0_3, %c0_4] : memref<1x128xf32, #tpu.memory_space<vmem>>, vector<1x128xf32>
    %5 = vector.broadcast %4 : vector<1x128xf32> to vector<128x128xf32>
    %6 = arith.addf %3, %5 : vector<128x128xf32>
    %cst_5 = arith.constant 0.000000e+00 : f32
    %7 = vector.broadcast %cst_5 : f32 to vector<128x128xf32>
    %8 = arith.cmpf ogt, %6, %7 : vector<128x128xf32>
    %cst_6 = arith.constant 0.00999999977 : f32
    %9 = vector.broadcast %cst_6 : f32 to vector<128x128xf32>
    %10 = arith.mulf %9, %6 : vector<128x128xf32>
    %11 = arith.select %8, %6, %10 : vector<128x128xi1>, vector<128x128xf32>
    %12 = arith.truncf %11 : vector<128x128xf32> to vector<128x128xbf16>
    %c0_7 = arith.constant 0 : index
    %c0_8 = arith.constant 0 : index
    %13 = vector.load %arg4[%c0_7, %c0_8] : memref<128x128xbf16, #tpu.memory_space<vmem>>, vector<128x128xbf16>
    %cst_9 = arith.constant dense<0.000000e+00> : vector<128x128xf32>
    %14 = tpu.matmul %12, %13, %cst_9 {dimension_numbers = #tpu.dot_dimension_numbers<[1], [0], [0], [1], [0, 0, 1, 1], [], []>} : vector<128x128xbf16>, vector<128x128xbf16>, vector<128x128xf32> -> vector<128x128xf32>
    %c0_10 = arith.constant 0 : index
    %c0_11 = arith.constant 0 : index
    %15 = vector.load %arg5[%c0_10, %c0_11] : memref<1x128xf32, #tpu.memory_space<vmem>>, vector<1x128xf32>
    %16 = vector.broadcast %15 : vector<1x128xf32> to vector<128x128xf32>
    %17 = arith.addf %14, %16 : vector<128x128xf32>
    %cst_12 = arith.constant 0.000000e+00 : f32
    %18 = vector.broadcast %cst_12 : f32 to vector<128x128xf32>
    %19 = arith.cmpf ogt, %17, %18 : vector<128x128xf32>
    %cst_13 = arith.constant 0.00999999977 : f32
    %20 = vector.broadcast %cst_13 : f32 to vector<128x128xf32>
    %21 = arith.mulf %20, %17 : vector<128x128xf32>
    %22 = arith.select %19, %17, %21 : vector<128x128xi1>, vector<128x128xf32>
    %23 = arith.truncf %22 : vector<128x128xf32> to vector<128x128xbf16>
    %c0_14 = arith.constant 0 : index
    %c0_15 = arith.constant 0 : index
    %24 = vector.load %arg6[%c0_14, %c0_15] : memref<128x128xbf16, #tpu.memory_space<vmem>>, vector<128x128xbf16>
    %cst_16 = arith.constant dense<0.000000e+00> : vector<128x128xf32>
    %25 = tpu.matmul %23, %24, %cst_16 {dimension_numbers = #tpu.dot_dimension_numbers<[1], [0], [0], [1], [0, 0, 1, 1], [], []>} : vector<128x128xbf16>, vector<128x128xbf16>, vector<128x128xf32> -> vector<128x128xf32>
    %c0_17 = arith.constant 0 : index
    %c0_18 = arith.constant 0 : index
    %26 = vector.load %arg7[%c0_17, %c0_18] : memref<1x128xf32, #tpu.memory_space<vmem>>, vector<1x128xf32>
    %27 = vector.broadcast %26 : vector<1x128xf32> to vector<128x128xf32>
    %28 = arith.addf %25, %27 : vector<128x128xf32>
    %cst_19 = arith.constant 0.000000e+00 : f32
    %29 = vector.broadcast %cst_19 : f32 to vector<128x128xf32>
    %30 = arith.cmpf ogt, %28, %29 : vector<128x128xf32>
    %cst_20 = arith.constant 0.00999999977 : f32
    %31 = vector.broadcast %cst_20 : f32 to vector<128x128xf32>
    %32 = arith.mulf %31, %28 : vector<128x128xf32>
    %33 = arith.select %30, %28, %32 : vector<128x128xi1>, vector<128x128xf32>
    %34 = arith.truncf %33 : vector<128x128xf32> to vector<128x128xbf16>
    %c0_21 = arith.constant 0 : index
    %c0_22 = arith.constant 0 : index
    %35 = vector.load %arg8[%c0_21, %c0_22] : memref<128x128xbf16, #tpu.memory_space<vmem>>, vector<128x128xbf16>
    tpu.vector_store %arg8[%c0_21, %c0_22], %34 {strides = array<i32>} : memref<128x128xbf16, #tpu.memory_space<vmem>>, vector<128x128xbf16>,
    return
  }
  func.func @transform_0(%arg0: i32) -> (i32, i32) {
    %c0_i32 = arith.constant 0 : i32
    %c0_i32_0 = arith.constant 0 : i32
    return %arg0, %c0_i32 : i32, i32
  }
  func.func @transform_1(%arg0: i32) -> (i32, i32) {
    %c0_i32 = arith.constant 0 : i32
    %c0_i32_0 = arith.constant 0 : i32
    %c0_i32_1 = arith.constant 0 : i32
    return %c0_i32, %c0_i32_0 : i32, i32
  }
  func.func @transform_2(%arg0: i32) -> (i32, i32) {
    %c0_i32 = arith.constant 0 : i32
    %c0_i32_0 = arith.constant 0 : i32
    %c0_i32_1 = arith.constant 0 : i32
    return %c0_i32, %c0_i32_0 : i32, i32
  }
  func.func @transform_3(%arg0: i32) -> (i32, i32) {
    %c0_i32 = arith.constant 0 : i32
    %c0_i32_0 = arith.constant 0 : i32
    %c0_i32_1 = arith.constant 0 : i32
    return %c0_i32, %c0_i32_0 : i32, i32
  }
  func.func @transform_4(%arg0: i32) -> (i32, i32) {
    %c0_i32 = arith.constant 0 : i32
    %c0_i32_0 = arith.constant 0 : i32
    %c0_i32_1 = arith.constant 0 : i32
    return %c0_i32, %c0_i32_0 : i32, i32
  }
  func.func @transform_5(%arg0: i32) -> (i32, i32) {
    %c0_i32 = arith.constant 0 : i32
    %c0_i32_0 = arith.constant 0 : i32
    %c0_i32_1 = arith.constant 0 : i32
    return %c0_i32, %c0_i32_0 : i32, i32
  }
  func.func @transform_6(%arg0: i32) -> (i32, i32) {
    %c0_i32 = arith.constant 0 : i32
    %c0_i32_0 = arith.constant 0 : i32
    %c0_i32_1 = arith.constant 0 : i32
    return %c0_i32, %c0_i32_0 : i32, i32
  }
  func.func @transform_7(%arg0: i32) -> (i32, i32) {
    %c0_i32 = arith.constant 0 : i32
    %c0_i32_0 = arith.constant 0 : i32
    return %arg0, %c0_i32 : i32, i32
  }
}

</mosaic_0001>

<bundles_post_ra>
// kernel: input_network.1
= control target key start
LH: loop header
LB: loop body
LE: loop exit
PB: predicated region body
PF: predicated region fallthrough
CT: control target
= control target key end

     0   :  { %s1815_s24 = smov 0   ;;  %s1817_s25 = smov 0   ;;  %s2109_s0 = inlined_call_operand.vmem [shape: f32[200,32], index: 0, kind: input, shape index: {}]   ;;  %s2110_s1 = inlined_call_operand.vmem [shape: bf16[32,128], index: 1, kind: input, shape index: {}]   ;;  %s2111_s2 = inlined_call_operand.vmem [shape: f32[1,128], index: 2, kind: input, shape index: {}]   ;;  %s2112_s3 = inlined_call_operand.vmem [shape: bf16[128,128], index: 3, kind: input, shape index: {}]   ;;  %s2113_s4 = inlined_call_operand.vmem [shape: f32[1,128], index: 4, kind: input, shape index: {}]   ;;  %s2114_s5 = inlined_call_operand.vmem [shape: bf16[128,128], index: 5, kind: input, shape index: {}]   ;;  %s2115_s6 = inlined_call_operand.vmem [shape: f32[1,128], index: 6, kind: input, shape index: {}]   ;;  %s2116_s7 = inlined_call_operand.vmem [shape: bf16[200,128], index: 7, kind: output, shape index: {}]  }
   0x1   :  { %s1819_s26 = smov 0  }
   0x2 LB: > { %s1828_s27 = sadd.s32 4294967295, %s1741_s26   ;;  %s1830_s28 = sadd.s32 1, %s1741_s26   ;;  %s1741_s26 = sphi %s1819_s26, %s2123_s26   ;;  %s1737_s25 = sphi %s1817_s25, %s2122_s25   ;;  %s1733_s24 = sphi %s1815_s24, %s2121_s24  }
   0x3   : > { %s173_s29 = ssub.s32 %s1741_s26, %s1830_s28  ;;  %s176_s30 = sadd.s32 1, %s1737_s25 }
   0x4   : > { %p174_p0 = scmp.eq.s32.totalorder %s173_s29, 0  ;;  %p186_p1 = scmp.ne.s32.totalorder %s1737_s25, %s1733_s24 }
   0x5   : > { %p187_p2 = scmp.eq.s32.totalorder %s1828_s27, 1  ;;  %p1323_p3 = scmp.ge.s32.totalorder %s1741_s26, 1 }
   0x6   : > { %s1838_s8 = scalar_select %p174_p0, %s1737_s25, %s176_s30  }
   0x7   : > { %p1840_p4 = por %p187_p2, %p186_p1  ;;  %p246_p5 = scmp.lt.s32.totalorder %s1741_s26, 3 }
   0x9   : > { %p247_p6 = pnand %p1323_p3, %p246_p5 }
   0xa   : > { %v1669_v0 = vld [vmem:[%s2110_s1] sm:$0xff] (!%p247_p6)   ;;  %s1848_s12 = sshll.u32 (!%p247_p6), %s1828_s27, 4  ;;  %v1670_v1 = vld [vmem:[%s2110_s1 + $0x8] sm:$0xff] (!%p247_p6)   ;;  %v1673_v4 = vld [vmem:[%s2112_s3 + $0x10] sm:$0xff] (!%p247_p6)   ;;  %vm348_vm0 = vcmask (!%p247_p6), 261120   ;;  %s278_s30 = sand.u32 (!%p247_p6), 1, %s1733_s24  }
   0xb   : > { %250 = sbr.rel (%p247_p6) target bundleno = 778 (0x30a), region = 48  ;;  %p286_p7 = scmp.lt.s32.totalorder (!%p247_p6), %s1848_s12, 24  ;;  %1497 = vmatprep.subr.bf16.mxu0 (!%p247_p6), %v1669_v0  ;;  %v1671_v2 = vld [vmem:[%s2112_s3] sm:$0xff] (!%p247_p6)   ;;  %v1672_v3 = vld [vmem:[%s2112_s3 + $0x8] sm:$0xff] (!%p247_p6)   ;;  %v1674_v14 = vld [vmem:[%s2112_s3 + $0x18] sm:$0xff] (!%p247_p6)  }
   0xc   : > { %1498 = vmatpush3.bf16.msra.mxu0 (!%p247_p6), %v1669_v0  ;;  %1517 = vmatprep.subr.bf16.mxu1 (!%p247_p6), %v1671_v2  ;;  %v1675_v19 = vld [vmem:[%s2112_s3 + $0x20] sm:$0xff] (!%p247_p6)   ;;  %v1676_v31 = vld [vmem:[%s2112_s3 + $0x28] sm:$0xff] (!%p247_p6)   ;;  %v1677_v32 = vld [vmem:[%s2112_s3 + $0x30] sm:$0xff] (!%p247_p6)   ;;  %s1324_s10 = sshll.u32 (!%p247_p6), %s278_s30, 6 }
   0xd   : > { %1499 = vmatprep.subr.bf16.mxu0 (!%p247_p6), %v1670_v1  ;;  %1518 = vmatpush3.bf16.msra.mxu1 (!%p247_p6), %v1671_v2  ;;  %v1678_v33 = vld [vmem:[%s2112_s3 + $0x38] sm:$0xff] (!%p247_p6)   ;;  %v1679_v34 = vld [vmem:[%s2114_s5] sm:$0xff] (!%p247_p6)   ;;  %v1680_v35 = vld [vmem:[%s2114_s5 + $0x8] sm:$0xff] (!%p247_p6)   ;;  %s1985_s24 = scalar_lea.vmem (!%p247_p6), [#allocation2], %s1324_s10  }
   0xe   : > { %1519 = vmatprep.subr.bf16.mxu1 (!%p247_p6), %v1672_v3  ;;  %v1681_v36 = vld [vmem:[%s2114_s5 + $0x10] sm:$0xff] (!%p247_p6)   ;;  %v1682_v37 = vld [vmem:[%s2114_s5 + $0x18] sm:$0xff] (!%p247_p6)   ;;  %v1683_v38 = vld [vmem:[%s2114_s5 + $0x20] sm:$0xff] (!%p247_p6)  }
   0xf   : > { %v1684_v39 = vld [vmem:[%s2114_s5 + $0x28] sm:$0xff] (!%p247_p6)   ;;  %v1929_v40 = vld [vmem:[%s2111_s2] ss:$0 sm:$0xff] (!%p247_p6) }
  0x10   : > { %1500 = vmatpush3.bf16.msra.mxu0 (!%p247_p6), %v1670_v1 }
  0x11   : > { %1520 = vmatpush3.bf16.msra.mxu1 (!%p247_p6), %v1672_v3  ;;  %1549 = vmatprep.subr.bf16.mxu0 (!%p247_p6), %v1679_v34 }
  0x12   : > { %s287_s17 = scalar_select %p286_p7, %s1848_s12, 24  ;;  %1521 = vmatprep.subr.bf16.mxu1 %v1673_v4 }
  0x13   : > { %s1054_s11 = ssub.s32 (%p1840_p4), 25, %s1848_s12  ;;  %s1405_s13 = sshll.u32 (%p1840_p4), %s1828_s27, 6 }
  0x14   : > { %s1326_s20 = sshll.u32 %s287_s17, 3  ;;  %p1055_p8 = scmp.lt.s32.totalorder (%p1840_p4), %s1054_s11, 16 }
  0x15   : > { %s1864_s23 = scalar_lea.vmem %s2109_s0, %s1326_s20  ;;  %1522 = vmatpush3.bf16.msra.mxu1 %v1673_v4  ;;  %s2013_s16 = scalar_lea.vmem (%p1840_p4), %s2116_s7, %s1405_s13  }
  0x16   : > { %v301_v5 = vld [vmem:[%s1864_s23] sm:$0xff]  ;;  %v302_v6 = vld [vmem:[%s1864_s23 + $0x8] sm:$0xff]  ;;  %v303_v7 = vld [vmem:[%s1864_s23 + $0x10] sm:$0xff]  ;;  %1523 = vmatprep.subr.bf16.mxu1 %v1674_v14 }
  0x17   : > { %v317_v8 = vpack.c.bf16 %v302_v6, %v301_v5  ;;  %v304_v9 = vld [vmem:[%s1864_s23 + $0x18] sm:$0xff]  ;;  %v305_v10 = vld [vmem:[%s1864_s23 + $0x20] sm:$0xff]  ;;  %v306_v11 = vld [vmem:[%s1864_s23 + $0x28] sm:$0xff] }
  0x18   : > { %v318_v12 = vpack.c.bf16 %v304_v9, %v303_v7  ;;  %v319_v13 = vpack.c.bf16 %v306_v11, %v305_v10  ;;  %v307_v15 = vld [vmem:[%s1864_s23 + $0x30] sm:$0xff]  ;;  %v308_v16 = vld [vmem:[%s1864_s23 + $0x38] sm:$0xff]  ;;  %v309_v17 = vld [vmem:[%s1864_s23 + $0x40] sm:$0xff] }
  0x19   : > { %1501 = vmatprep.mubr.msk.bf16.mxu0 %vm348_vm0, %v317_v8  ;;  %v310_v18 = vld [vmem:[%s1864_s23 + $0x48] sm:$0xff]  ;;  %v320_v20 = vpack.c.bf16 %v308_v16, %v307_v15  ;;  %1524 = vmatpush3.bf16.msra.mxu1 %v1674_v14  ;;  %v311_v22 = vld [vmem:[%s1864_s23 + $0x50] sm:$0xff]  ;;  %v312_v23 = vld [vmem:[%s1864_s23 + $0x58] sm:$0xff] }
  0x1a   : > { %1502 = vmatmul.mubr.msk.bf16.vlgmr.msra.gmra.mrb[0].mxu0 %vm348_vm0, %v318_v12  ;;  %v321_v21 = vpack.c.bf16 %v310_v18, %v309_v17  ;;  %1525 = vmatprep.subr.bf16.mxu1 %v1675_v19  ;;  %v313_v24 = vld [vmem:[%s1864_s23 + $0x60] sm:$0xff]  ;;  %v314_v25 = vld [vmem:[%s1864_s23 + $0x68] sm:$0xff]  ;;  %v322_v26 = vpack.c.bf16 %v312_v23, %v311_v22  ;;  %v315_v28 = vld [vmem:[%s1864_s23 + $0x70] sm:$0xff] }
  0x1b   : > { %1505 = vmatprep.mubr.msk.bf16.mxu0 %vm348_vm0, %v319_v13  ;;  %v323_v27 = vpack.c.bf16 %v314_v25, %v313_v24  ;;  %v316_v29 = vld [vmem:[%s1864_s23 + $0x78] sm:$0xff]  ;;  %1550 = vmatpush3.bf16.msra.mxu0 %v1679_v34 }
  0x1c   : > { %v324_v30 = vpack.c.bf16 %v316_v29, %v315_v28  ;;  %1551 = vmatprep.subr.bf16.mxu0 %v1680_v35 }
  0x1d   : > { %1526 = vmatpush3.bf16.msra.mxu1 %v1675_v19 }
  0x1e   : > { %1527 = vmatprep.subr.bf16.mxu1 %v1676_v31 }
  0x1f   : > { %1552 = vmatpush3.bf16.msra.mxu0 %v1680_v35 }
  0x20   : > { %1553 = vmatprep.subr.bf16.mxu0 %v1681_v36 }
  0x21   : > { %1528 = vmatpush3.bf16.msra.mxu1 %v1676_v31 }
  0x22   : > { %1506 = vmatmul.mubr.msk.bf16.gmra.mrb[4].mxu0 %vm348_vm0, %v320_v20  ;;  %1529 = vmatprep.subr.bf16.mxu1 %v1677_v32 }
  0x23   : > { %1509 = vmatprep.mubr.msk.bf16.mxu0 %vm348_vm0, %v321_v21  ;;  %1554 = vmatpush3.bf16.msra.mxu0 %v1681_v36 }
  0x24   : > { %1555 = vmatprep.subr.bf16.mxu0 %v1682_v37 }
  0x25   : > { %1530 = vmatpush3.bf16.msra.mxu1 %v1677_v32 }
  0x26   : > { %1531 = vmatprep.subr.bf16.mxu1 %v1678_v33 }
  0x27   : > { %1556 = vmatpush3.bf16.msra.mxu0 %v1682_v37 }
  0x28   : > { %1557 = vmatprep.subr.bf16.mxu0 %v1683_v38 }
  0x29   : > { %1532 = vmatpush3.bf16.msra.mxu1 %v1678_v33 }
  0x2a   : > { %1510 = vmatmul.mubr.msk.bf16.gmra.mrb[8].mxu0 %vm348_vm0, %v322_v26 }
  0x2b   : > { %1513 = vmatprep.mubr.msk.bf16.mxu0 %vm348_vm0, %v323_v27  ;;  %1558 = vmatpush3.bf16.msra.mxu0 %v1683_v38 }
  0x2c   : > { %1559 = vmatprep.subr.bf16.mxu0 %v1684_v39 }
  0x2f   : > { %1560 = vmatpush3.bf16.msra.mxu0 %v1684_v39 }
  0x32   : > { %1514 = vmatmul.mubr.msk.bf16.gmra.mrb[12].mxu0 %vm348_vm0, %v324_v30 }
  0xed   : > { %v1503_v41 = vpop.f32.mrb[0].mxu0 }
  0xee   : > { %v416_v42 = vadd.f32 %v1503_v41, %v1929_v40  ;;  %v407_v43 = vpop.f32.mrb[1].mxu0 }
  0xef   : > { %v408_v44 = vadd.f32 %v1929_v40, %v407_v43  ;;  %v1504_v45 = vpop.f32.mrb[2].mxu0 }
  0xf0   : > { %v488_v46 = vmul.f32 0.01, %v416_v42  ;;  %v419_v47 = vadd.f32 %v1504_v45, %v1929_v40  ;;  %v410_v48 = vpop.f32.mrb[3].mxu0  ;;  %vm472_vm1 = vcmp.gt.f32.partialorder %v416_v42, 0.0 }
  0xf1   : > { %v486_v49 = vmul.f32 0.01, %v408_v44  ;;  %v411_v50 = vadd.f32 %v1929_v40, %v410_v48  ;;  %vm470_vm3 = vcmp.gt.f32.partialorder %v408_v44, 0.0 }
  0xf2   : > { %vm473_vm2 = vcmp.gt.f32.partialorder %v419_v47, 0.0  ;;  %v489_v51 = vmul.f32 0.01, %v419_v47  ;;  %v504_v53 = vsel %vm472_vm1, %v416_v42, %v488_v46 }
  0xf3   : > { %v487_v52 = vmul.f32 0.01, %v411_v50  ;;  %vm471_vm4 = vcmp.gt.f32.partialorder %v411_v50, 0.0  ;;  %v502_v56 = vsel %vm470_vm3, %v408_v44, %v486_v49 }
  0xf4   : > { %v505_v54 = vsel %vm473_vm2, %v419_v47, %v489_v51  ;;  %v1956_v51 = vld [vmem:[%s2113_s4] ss:$0 sm:$0xff] }
  0xf5   : > { %v1507_v55 = vpop.f32.mrb[4].mxu0  ;;  %v503_v57 = vsel %vm471_vm4, %v411_v50, %v487_v52  ;;  %v519_v58 = vpack.c.bf16 %v505_v54, %v504_v53  ;;  %v1685_v50 = vld [vmem:[%s2114_s5 + $0x30] sm:$0xff]  }
  0xf6   : > { %v432_v59 = vadd.f32 %v1507_v55, %v1929_v40  ;;  %v423_v60 = vpop.f32.mrb[5].mxu0  ;;  %v518_v61 = vpack.c.bf16 %v503_v57, %v502_v56  ;;  %1561 = vmatprep.subr.bf16.mxu0 %v1685_v50 }
  0xf7   : > { %v424_v62 = vadd.f32 %v1929_v40, %v423_v60  ;;  %v1508_v63 = vpop.f32.mrb[6].mxu0  ;;  %1562 = vmatpush3.bf16.msra.mxu0 %v1685_v50 }
  0xf8   : > { %v492_v0 = vmul.f32 0.01, %v432_v59  ;;  %v435_v1 = vadd.f32 %v1508_v63, %v1929_v40  ;;  %v426_v2 = vpop.f32.mrb[7].mxu0  ;;  %1533 = vmatprep.mubr.bf16.mxu1 %v518_v61  ;;  %vm476_vm5 = vcmp.gt.f32.partialorder %v432_v59, 0.0 }
  0xf9   : > { %v490_v3 = vmul.f32 0.01, %v424_v62  ;;  %v427_v4 = vadd.f32 %v1929_v40, %v426_v2  ;;  %1534 = vmatmul.mubr.bf16.vlgmr.msra.gmra.mrb[0].mxu1 %v519_v58  ;;  %vm474_vm6 = vcmp.gt.f32.partialorder %v424_v62, 0.0 }
  0xfa   : > { %vm477_vm7 = vcmp.gt.f32.partialorder %v435_v1, 0.0  ;;  %v493_v5 = vmul.f32 0.01, %v435_v1  ;;  %v508_v7 = vsel %vm476_vm5, %v432_v59, %v492_v0 }
  0xfb   : > { %vm475_vm8 = vcmp.gt.f32.partialorder %v427_v4, 0.0  ;;  %v491_v6 = vmul.f32 0.01, %v427_v4  ;;  %v506_v10 = vsel %vm474_vm6, %v424_v62, %v490_v3 }
  0xfc   : > { %v509_v8 = vsel %vm477_vm7, %v435_v1, %v493_v5 }
  0xfd   : > { %v1511_v9 = vpop.f32.mrb[8].mxu0  ;;  %v507_v11 = vsel %vm475_vm8, %v427_v4, %v491_v6  ;;  %v521_v12 = vpack.c.bf16 %v509_v8, %v508_v7 }
  0xfe   : > { %v448_v13 = vadd.f32 %v1511_v9, %v1929_v40  ;;  %v439_v14 = vpop.f32.mrb[9].mxu0  ;;  %v520_v15 = vpack.c.bf16 %v507_v11, %v506_v10 }
  0xff   : > { %v440_v16 = vadd.f32 %v1929_v40, %v439_v14  ;;  %v1512_v17 = vpop.f32.mrb[10].mxu0 }
 0x100   : > { %v496_v18 = vmul.f32 0.01, %v448_v13  ;;  %v451_v19 = vadd.f32 %v1512_v17, %v1929_v40  ;;  %v442_v20 = vpop.f32.mrb[11].mxu0  ;;  %1537 = vmatprep.mubr.bf16.mxu1 %v520_v15  ;;  %vm480_vm9 = vcmp.gt.f32.partialorder %v448_v13, 0.0 }
 0x101   : > { %v494_v21 = vmul.f32 0.01, %v440_v16  ;;  %v443_v22 = vadd.f32 %v1929_v40, %v442_v20  ;;  %1538 = vmatmul.mubr.bf16.gmra.mrb[4].mxu1 %v521_v12  ;;  %vm478_vm10 = vcmp.gt.f32.partialorder %v440_v16, 0.0 }
 0x102   : > { %vm481_vm11 = vcmp.gt.f32.partialorder %v451_v19, 0.0  ;;  %v497_v23 = vmul.f32 0.01, %v451_v19  ;;  %v512_v25 = vsel %vm480_vm9, %v448_v13, %v496_v18 }
 0x103   : > { %vm479_vm12 = vcmp.gt.f32.partialorder %v443_v22, 0.0  ;;  %v495_v24 = vmul.f32 0.01, %v443_v22  ;;  %v510_v28 = vsel %vm478_vm10, %v440_v16, %v494_v21 }
 0x104   : > { %v513_v26 = vsel %vm481_vm11, %v451_v19, %v497_v23 }
 0x105   : > { %v1515_v27 = vpop.f32.mrb[12].mxu0  ;;  %v511_v29 = vsel %vm479_vm12, %v443_v22, %v495_v24  ;;  %v523_v30 = vpack.c.bf16 %v513_v26, %v512_v25 }
 0x106   : > { %v464_v31 = vadd.f32 %v1515_v27, %v1929_v40  ;;  %v455_v32 = vpop.f32.mrb[13].mxu0  ;;  %v522_v33 = vpack.c.bf16 %v511_v29, %v510_v28 }
 0x107   : > { %v456_v34 = vadd.f32 %v1929_v40, %v455_v32  ;;  %v1516_v35 = vpop.f32.mrb[14].mxu0 }
 0x108   : > { %v500_v36 = vmul.f32 0.01, %v464_v31  ;;  %v467_v37 = vadd.f32 %v1516_v35, %v1929_v40  ;;  %v458_v38 = vpop.f32.mrb[15].mxu0  ;;  %1541 = vmatprep.mubr.bf16.mxu1 %v522_v33  ;;  %vm484_vm13 = vcmp.gt.f32.partialorder %v464_v31, 0.0 }
 0x109   : > { %v498_v39 = vmul.f32 0.01, %v456_v34  ;;  %v459_v41 = vadd.f32 %v1929_v40, %v458_v38  ;;  %1542 = vmatmul.mubr.bf16.gmra.mrb[8].mxu1 %v523_v30  ;;  %vm482_vm14 = vcmp.gt.f32.partialorder %v456_v34, 0.0  ;;  %v1686_v40 = vld [vmem:[%s2114_s5 + $0x38] sm:$0xff]  }
 0x10a   : > { %vm485_vm15 = vcmp.gt.f32.partialorder %v467_v37, 0.0  ;;  %v501_v42 = vmul.f32 0.01, %v467_v37  ;;  %v516_v44 = vsel %vm484_vm13, %v464_v31, %v500_v36  ;;  %1563 = vmatprep.subr.bf16.mxu0 %v1686_v40 }
 0x10b   : > { %vm483_vm0 = vcmp.gt.f32.partialorder %v459_v41, 0.0  ;;  %v499_v43 = vmul.f32 0.01, %v459_v41  ;;  %v514_v46 = vsel %vm482_vm14, %v456_v34, %v498_v39  ;;  %1564 = vmatpush3.bf16.msra.mxu0 %v1686_v40 }
 0x10c   : > { %v517_v45 = vsel %vm485_vm15, %v467_v37, %v501_v42 }
 0x10d   : > { %v515_v47 = vsel %vm483_vm0, %v459_v41, %v499_v43  ;;  %v525_v48 = vpack.c.bf16 %v517_v45, %v516_v44 }
 0x10e   : > { %v524_v49 = vpack.c.bf16 %v515_v47, %v514_v46 }
 0x110   : > { %1545 = vmatprep.mubr.bf16.mxu1 %v524_v49 }
 0x111   : > { %1546 = vmatmul.mubr.bf16.gmra.mrb[12].mxu1 %v525_v48 }
 0x1cc   : > { %v1535_v52 = vpop.f32.mrb[0].mxu1 }
 0x1cd   : > { %v640_v53 = vadd.f32 %v1535_v52, %v1956_v51  ;;  %v631_v54 = vpop.f32.mrb[1].mxu1 }
 0x1ce   : > { %v632_v55 = vadd.f32 %v1956_v51, %v631_v54  ;;  %v1536_v56 = vpop.f32.mrb[2].mxu1 }
 0x1cf   : > { %v712_v57 = vmul.f32 0.01, %v640_v53  ;;  %v643_v58 = vadd.f32 %v1536_v56, %v1956_v51  ;;  %v634_v59 = vpop.f32.mrb[3].mxu1  ;;  %vm696_vm1 = vcmp.gt.f32.partialorder %v640_v53, 0.0 }
 0x1d0   : > { %v710_v60 = vmul.f32 0.01, %v632_v55  ;;  %v635_v61 = vadd.f32 %v1956_v51, %v634_v59  ;;  %vm694_vm2 = vcmp.gt.f32.partialorder %v632_v55, 0.0 }
 0x1d1   : > { %vm697_vm3 = vcmp.gt.f32.partialorder %v643_v58, 0.0  ;;  %v713_v62 = vmul.f32 0.01, %v643_v58  ;;  %v728_v0 = vsel %vm696_vm1, %v640_v53, %v712_v57 }
 0x1d2   : > { %vm695_vm4 = vcmp.gt.f32.partialorder %v635_v61, 0.0  ;;  %v711_v63 = vmul.f32 0.01, %v635_v61  ;;  %v726_v4 = vsel %vm694_vm2, %v632_v55, %v710_v60 }
 0x1d3   : > { %v729_v1 = vsel %vm697_vm3, %v643_v58, %v713_v62 }
 0x1d4   : > { %v743_v2 = vpack.c.bf16 %v729_v1, %v728_v0  ;;  %v1539_v3 = vpop.f32.mrb[4].mxu1  ;;  %v727_v5 = vsel %vm695_vm4, %v635_v61, %v711_v63  ;;  %v1977_v61 = vld [vmem:[%s2115_s6] ss:$0 sm:$0xff] }
 0x1d5   : > { %v656_v6 = vadd.f32 %v1539_v3, %v1956_v51  ;;  %v647_v7 = vpop.f32.mrb[5].mxu1  ;;  %v742_v8 = vpack.c.bf16 %v727_v5, %v726_v4 }
 0x1d6   : > { %v648_v9 = vadd.f32 %v1956_v51, %v647_v7  ;;  %v1540_v10 = vpop.f32.mrb[6].mxu1 }
 0x1d7   : > { %v716_v11 = vmul.f32 0.01, %v656_v6  ;;  %v659_v12 = vadd.f32 %v1540_v10, %v1956_v51  ;;  %v650_v13 = vpop.f32.mrb[7].mxu1  ;;  %1565 = vmatprep.mubr.bf16.mxu0 %v742_v8  ;;  %vm700_vm5 = vcmp.gt.f32.partialorder %v656_v6, 0.0 }
 0x1d8   : > { %v714_v14 = vmul.f32 0.01, %v648_v9  ;;  %v651_v15 = vadd.f32 %v1956_v51, %v650_v13  ;;  %1566 = vmatmul.mubr.bf16.vlgmr.msra.gmra.mrb[16].mxu0 %v743_v2  ;;  %vm698_vm6 = vcmp.gt.f32.partialorder %v648_v9, 0.0 }
 0x1d9   : > { %vm701_vm7 = vcmp.gt.f32.partialorder %v659_v12, 0.0  ;;  %v717_v16 = vmul.f32 0.01, %v659_v12  ;;  %v732_v18 = vsel %vm700_vm5, %v656_v6, %v716_v11 }
 0x1da   : > { %vm699_vm8 = vcmp.gt.f32.partialorder %v651_v15, 0.0  ;;  %v715_v17 = vmul.f32 0.01, %v651_v15  ;;  %v730_v21 = vsel %vm698_vm6, %v648_v9, %v714_v14 }
 0x1db   : > { %v733_v19 = vsel %vm701_vm7, %v659_v12, %v717_v16 }
 0x1dc   : > { %v1543_v20 = vpop.f32.mrb[8].mxu1  ;;  %v731_v22 = vsel %vm699_vm8, %v651_v15, %v715_v17  ;;  %v745_v23 = vpack.c.bf16 %v733_v19, %v732_v18 }
 0x1dd   : > { %v672_v24 = vadd.f32 %v1543_v20, %v1956_v51  ;;  %v663_v25 = vpop.f32.mrb[9].mxu1  ;;  %v744_v26 = vpack.c.bf16 %v731_v22, %v730_v21 }
 0x1de   : > { %v664_v27 = vadd.f32 %v1956_v51, %v663_v25  ;;  %v1544_v28 = vpop.f32.mrb[10].mxu1 }
 0x1df   : > { %v720_v29 = vmul.f32 0.01, %v672_v24  ;;  %v675_v30 = vadd.f32 %v1544_v28, %v1956_v51  ;;  %v666_v31 = vpop.f32.mrb[11].mxu1  ;;  %1569 = vmatprep.mubr.bf16.mxu0 %v744_v26  ;;  %vm704_vm9 = vcmp.gt.f32.partialorder %v672_v24, 0.0 }
 0x1e0   : > { %v718_v32 = vmul.f32 0.01, %v664_v27  ;;  %v667_v33 = vadd.f32 %v1956_v51, %v666_v31  ;;  %1570 = vmatmul.mubr.bf16.gmra.mrb[20].mxu0 %v745_v23  ;;  %vm702_vm10 = vcmp.gt.f32.partialorder %v664_v27, 0.0 }
 0x1e1   : > { %vm705_vm11 = vcmp.gt.f32.partialorder %v675_v30, 0.0  ;;  %v721_v34 = vmul.f32 0.01, %v675_v30  ;;  %v736_v36 = vsel %vm704_vm9, %v672_v24, %v720_v29 }
 0x1e2   : > { %vm703_vm12 = vcmp.gt.f32.partialorder %v667_v33, 0.0  ;;  %v719_v35 = vmul.f32 0.01, %v667_v33  ;;  %v734_v39 = vsel %vm702_vm10, %v664_v27, %v718_v32 }
 0x1e3   : > { %v737_v37 = vsel %vm705_vm11, %v675_v30, %v721_v34 }
 0x1e4   : > { %v1547_v38 = vpop.f32.mrb[12].mxu1  ;;  %v735_v41 = vsel %vm703_vm12, %v667_v33, %v719_v35  ;;  %v747_v42 = vpack.c.bf16 %v737_v37, %v736_v36 }
 0x1e5   : > { %v688_v43 = vadd.f32 %v1547_v38, %v1956_v51  ;;  %v679_v44 = vpop.f32.mrb[13].mxu1  ;;  %v746_v45 = vpack.c.bf16 %v735_v41, %v734_v39 }
 0x1e6   : > { %v680_v46 = vadd.f32 %v1956_v51, %v679_v44  ;;  %v1548_v47 = vpop.f32.mrb[14].mxu1 }
 0x1e7   : > { %v724_v48 = vmul.f32 0.01, %v688_v43  ;;  %v691_v49 = vadd.f32 %v1548_v47, %v1956_v51  ;;  %v682_v50 = vpop.f32.mrb[15].mxu1  ;;  %1573 = vmatprep.mubr.bf16.mxu0 %v746_v45  ;;  %vm708_vm13 = vcmp.gt.f32.partialorder %v688_v43, 0.0 }
 0x1e8   : > { %v722_v40 = vmul.f32 0.01, %v680_v46  ;;  %v683_v52 = vadd.f32 %v1956_v51, %v682_v50  ;;  %1574 = vmatmul.mubr.bf16.gmra.mrb[24].mxu0 %v747_v42  ;;  %vm706_vm14 = vcmp.gt.f32.partialorder %v680_v46, 0.0 }
 0x1e9   : > { %vm709_vm15 = vcmp.gt.f32.partialorder %v691_v49, 0.0  ;;  %v725_v53 = vmul.f32 0.01, %v691_v49  ;;  %v740_v55 = vsel %vm708_vm13, %v688_v43, %v724_v48 }
 0x1ea   : > { %vm707_vm0 = vcmp.gt.f32.partialorder %v683_v52, 0.0  ;;  %v723_v54 = vmul.f32 0.01, %v683_v52  ;;  %v738_v57 = vsel %vm706_vm14, %v680_v46, %v722_v40 }
 0x1eb   : > { %v741_v56 = vsel %vm709_vm15, %v691_v49, %v725_v53 }
 0x1ec   : > { %v739_v58 = vsel %vm707_vm0, %v683_v52, %v723_v54  ;;  %v749_v59 = vpack.c.bf16 %v741_v56, %v740_v55 }
 0x1ed   : > { %v748_v60 = vpack.c.bf16 %v739_v58, %v738_v57 }
 0x1ef   : > { %1577 = vmatprep.mubr.bf16.mxu0 %v748_v60 }
 0x1f0   : > { %1578 = vmatmul.mubr.bf16.gmra.mrb[28].mxu0 %v749_v59 }
 0x2ab   : > { %v1567_v51 = vpop.f32.mrb[16].mxu0 }
 0x2ac   : > { %v864_v62 = vadd.f32 %v1567_v51, %v1977_v61  ;;  %v855_v63 = vpop.f32.mrb[17].mxu0 }
 0x2ad   : > { %v856_v0 = vadd.f32 %v1977_v61, %v855_v63  ;;  %v1568_v1 = vpop.f32.mrb[18].mxu0 }
 0x2ae   : > { %v936_v2 = vmul.f32 0.01, %v864_v62  ;;  %v867_v3 = vadd.f32 %v1568_v1, %v1977_v61  ;;  %v858_v4 = vpop.f32.mrb[19].mxu0  ;;  %vm920_vm1 = vcmp.gt.f32.partialorder %v864_v62, 0.0 }
 0x2af   : > { %v934_v5 = vmul.f32 0.01, %v856_v0  ;;  %v859_v6 = vadd.f32 %v1977_v61, %v858_v4  ;;  %vm918_vm2 = vcmp.gt.f32.partialorder %v856_v0, 0.0 }
 0x2b0   : > { %vm921_vm3 = vcmp.gt.f32.partialorder %v867_v3, 0.0  ;;  %v937_v7 = vmul.f32 0.01, %v867_v3  ;;  %v952_v9 = vsel %vm920_vm1, %v864_v62, %v936_v2 }
 0x2b1   : > { %vm919_vm4 = vcmp.gt.f32.partialorder %v859_v6, 0.0  ;;  %v935_v8 = vmul.f32 0.01, %v859_v6  ;;  %v950_v11 = vsel %vm918_vm2, %v856_v0, %v934_v5 }
 0x2b2   : > { %v953_v10 = vsel %vm921_vm3, %v867_v3, %v937_v7 }
 0x2b3   : > { %v1416_v12 = vpack.c.bf16 %v953_v10, %v952_v9  ;;  %v951_v13 = vsel %vm919_vm4, %v859_v6, %v935_v8  ;;  %v1571_v14 = vpop.f32.mrb[20].mxu0 }
 0x2b4   : > { %v1411_v15 = vpack.c.bf16 %v951_v13, %v950_v11  ;;  %v880_v16 = vadd.f32 %v1571_v14, %v1977_v61  ;;  %v871_v17 = vpop.f32.mrb[21].mxu0 }
 0x2b5   : > { %1448 = vst [vmem:[%s1985_s24 + $0x8] sm:$0xff] %v1416_v12   ;;  %v872_v18 = vadd.f32 %v1977_v61, %v871_v17  ;;  %v1572_v19 = vpop.f32.mrb[22].mxu0 }
 0x2b6   : > { %1412 = vst [vmem:[%s1985_s24] sm:$0xff] %v1411_v15   ;;  %v940_v20 = vmul.f32 0.01, %v880_v16  ;;  %v883_v21 = vadd.f32 %v1572_v19, %v1977_v61  ;;  %v874_v22 = vpop.f32.mrb[23].mxu0  ;;  %vm924_vm5 = vcmp.gt.f32.partialorder %v880_v16, 0.0 }
 0x2b7   : > { %v938_v23 = vmul.f32 0.01, %v872_v18  ;;  %v875_v24 = vadd.f32 %v1977_v61, %v874_v22  ;;  %vm922_vm6 = vcmp.gt.f32.partialorder %v872_v18, 0.0 }
 0x2b8   : > { %vm925_vm7 = vcmp.gt.f32.partialorder %v883_v21, 0.0  ;;  %v941_v25 = vmul.f32 0.01, %v883_v21  ;;  %v956_v27 = vsel %vm924_vm5, %v880_v16, %v940_v20 }
 0x2b9   : > { %vm923_vm8 = vcmp.gt.f32.partialorder %v875_v24, 0.0  ;;  %v939_v26 = vmul.f32 0.01, %v875_v24  ;;  %v954_v29 = vsel %vm922_vm6, %v872_v18, %v938_v23 }
 0x2ba   : > { %v957_v28 = vsel %vm925_vm7, %v883_v21, %v941_v25 }
 0x2bb   : > { %v1426_v30 = vpack.c.bf16 %v957_v28, %v956_v27  ;;  %v955_v31 = vsel %vm923_vm8, %v875_v24, %v939_v26  ;;  %v1575_v32 = vpop.f32.mrb[24].mxu0 }
 0x2bc   : > { %v1421_v33 = vpack.c.bf16 %v955_v31, %v954_v29  ;;  %v896_v34 = vadd.f32 %v1575_v32, %v1977_v61  ;;  %v887_v35 = vpop.f32.mrb[25].mxu0 }
 0x2bd   : > { %1450 = vst [vmem:[%s1985_s24 + $0x18] sm:$0xff] %v1426_v30   ;;  %v888_v36 = vadd.f32 %v1977_v61, %v887_v35  ;;  %v1576_v37 = vpop.f32.mrb[26].mxu0 }
 0x2be   : > { %1449 = vst [vmem:[%s1985_s24 + $0x10] sm:$0xff] %v1421_v33   ;;  %v944_v38 = vmul.f32 0.01, %v896_v34  ;;  %v899_v39 = vadd.f32 %v1576_v37, %v1977_v61  ;;  %v890_v41 = vpop.f32.mrb[27].mxu0  ;;  %vm928_vm9 = vcmp.gt.f32.partialorder %v896_v34, 0.0 }
 0x2bf   : > { %v942_v42 = vmul.f32 0.01, %v888_v36  ;;  %v891_v43 = vadd.f32 %v1977_v61, %v890_v41  ;;  %vm926_vm10 = vcmp.gt.f32.partialorder %v888_v36, 0.0 }
 0x2c0   : > { %vm929_vm11 = vcmp.gt.f32.partialorder %v899_v39, 0.0  ;;  %v945_v44 = vmul.f32 0.01, %v899_v39  ;;  %v960_v46 = vsel %vm928_vm9, %v896_v34, %v944_v38 }
 0x2c1   : > { %vm927_vm12 = vcmp.gt.f32.partialorder %v891_v43, 0.0  ;;  %v943_v45 = vmul.f32 0.01, %v891_v43  ;;  %v958_v48 = vsel %vm926_vm10, %v888_v36, %v942_v42 }
 0x2c2   : > { %v961_v47 = vsel %vm929_vm11, %v899_v39, %v945_v44 }
 0x2c3   : > { %v1436_v49 = vpack.c.bf16 %v961_v47, %v960_v46  ;;  %v959_v50 = vsel %vm927_vm12, %v891_v43, %v943_v45  ;;  %v1579_v40 = vpop.f32.mrb[28].mxu0 }
 0x2c4   : > { %v1431_v52 = vpack.c.bf16 %v959_v50, %v958_v48  ;;  %v912_v53 = vadd.f32 %v1579_v40, %v1977_v61  ;;  %v903_v54 = vpop.f32.mrb[29].mxu0 }
 0x2c5   : > { %1452 = vst [vmem:[%s1985_s24 + $0x28] sm:$0xff] %v1436_v49   ;;  %v904_v55 = vadd.f32 %v1977_v61, %v903_v54  ;;  %v1580_v56 = vpop.f32.mrb[30].mxu0 }
 0x2c6   : > { %1451 = vst [vmem:[%s1985_s24 + $0x20] sm:$0xff] %v1431_v52   ;;  %v948_v57 = vmul.f32 0.01, %v912_v53  ;;  %v915_v58 = vadd.f32 %v1580_v56, %v1977_v61  ;;  %v906_v59 = vpop.f32.mrb[31].mxu0  ;;  %vm932_vm13 = vcmp.gt.f32.partialorder %v912_v53, 0.0 }
 0x2c7   : > { %v946_v60 = vmul.f32 0.01, %v904_v55  ;;  %v907_v51 = vadd.f32 %v1977_v61, %v906_v59  ;;  %vm930_vm14 = vcmp.gt.f32.partialorder %v904_v55, 0.0 }
 0x2c8   : > { %vm933_vm15 = vcmp.gt.f32.partialorder %v915_v58, 0.0  ;;  %v949_v62 = vmul.f32 0.01, %v915_v58  ;;  %v964_v0 = vsel %vm932_vm13, %v912_v53, %v948_v57  ;;  %1052 = sbr.rel (!%p1840_p4) target bundleno = 778 (0x30a), region = 52 }
 0x2c9   : > { %vm931_vm0 = vcmp.gt.f32.partialorder %v907_v51, 0.0  ;;  %v947_v63 = vmul.f32 0.01, %v907_v51  ;;  %v962_v2 = vsel %vm930_vm14, %v904_v55, %v946_v60 }
 0x2ca   : > { %v965_v1 = vsel %vm933_vm15, %v915_v58, %v949_v62 }
 0x2cb   : > { %v1446_v3 = vpack.c.bf16 %v965_v1, %v964_v0  ;;  %v963_v4 = vsel %vm931_vm0, %v907_v51, %v947_v63 }
 0x2cc   : > { %v1441_v5 = vpack.c.bf16 %v963_v4, %v962_v2 }
 0x2cd   : > { %1454 = vst [vmem:[%s1985_s24 + $0x38] sm:$0xff] %v1446_v3  }
 0x2ce   : > { %1453 = vst [vmem:[%s1985_s24 + $0x30] sm:$0xff] %v1441_v5  }
 0x2cf   : > { %s2125_s11 = smov (!%p1055_p8, %s1054_s11), 16 }
 0x2d0   : > { %s1374_s17 = sshll.u32 %s2125_s11, 6 }
 0x2d1   : > { %p1377_p9 = scmp.eq.s32.totalorder %s1374_s17, 0 }
 0x2d2   : > { %s2019_s18 = sshrl.u32 (!%p1377_p9), %s2125_s11, 4 }
 0x2d3   : > { %1063 = sbr.rel (%p1377_p9) target bundleno = 778 (0x30a), region = 56  ;;  %p1378_p10 = scmp.le.s32.totalorder (!%p1377_p9), %s2019_s18, 0 }
 0x2da   : > { %1276 = sbr.rel (%p1378_p10) target bundleno = 757 (0x2f5), region = 128  ;;  %s2118_s27 = smov (!%p1378_p10), %s2013_s16 }
 0x2db   : > { %s2119_s9 = smov (!%p1378_p10), %s1985_s24  ;;  %s2028_s12 = smov (!%p1378_p10), 0  }
 0x2dc   : > { %s2030_s19 = smov (!%p1378_p10), 0  }
 0x2e1 LB: >> { %v1079_v61 = vld [vmem:[%s1749_s9] sm:$0xf]  ;;  %v1081_v6 = vld [vmem:[%s1749_s9 + $0x4] sm:$0xf]  ;;  %v1083_v7 = vld [vmem:[%s1749_s9 + $0x8] sm:$0xf]  ;;  %s1757_s19 = sphi %s2030_s19, %s1073_s19   ;;  %s1753_s12 = sphi %s2028_s12, %s2120_s12   ;;  %s1749_s9 = sphi %s2119_s9, %s1116_s9   ;;  %s1745_s27 = sphi %s2118_s27, %s1117_s27  }
 0x2e2   : >> { %1080 = vst [vmem:[%s1745_s27] sm:$0xf] %v1079_v61  ;;  %1082 = vst [vmem:[%s1745_s27 + $0x4] sm:$0xf] %v1081_v6  ;;  %v1085_v8 = vld [vmem:[%s1749_s9 + $0xc] sm:$0xf]  ;;  %s1111_s20 = sadd.s32 1, %s1753_s12 }
 0x2e3   : >> { %1084 = vst [vmem:[%s1745_s27 + $0x8] sm:$0xf] %v1083_v7  ;;  %v1087_v9 = vld [vmem:[%s1749_s9 + $0x10] sm:$0xf]  ;;  %v1089_v10 = vld [vmem:[%s1749_s9 + $0x14] sm:$0xf]  ;;  %p1112_p11 = scmp.ge.s32.totalorder %s1111_s20, %s2019_s18 }
 0x2e4   : >> { %1086 = vst [vmem:[%s1745_s27 + $0xc] sm:$0xf] %v1085_v8  ;;  %1088 = vst [vmem:[%s1745_s27 + $0x10] sm:$0xf] %v1087_v9  ;;  %v1091_v11 = vld [vmem:[%s1749_s9 + $0x18] sm:$0xf] }
 0x2e5   : >> { %1090 = vst [vmem:[%s1745_s27 + $0x14] sm:$0xf] %v1089_v10  ;;  %v1093_v12 = vld [vmem:[%s1749_s9 + $0x1c] sm:$0xf]  ;;  %v1095_v13 = vld [vmem:[%s1749_s9 + $0x20] sm:$0xf] }
 0x2e6   : >> { %1092 = vst [vmem:[%s1745_s27 + $0x18] sm:$0xf] %v1091_v11  ;;  %1094 = vst [vmem:[%s1745_s27 + $0x1c] sm:$0xf] %v1093_v12  ;;  %v1097_v14 = vld [vmem:[%s1749_s9 + $0x24] sm:$0xf] }
 0x2e7   : >> { %1096 = vst [vmem:[%s1745_s27 + $0x20] sm:$0xf] %v1095_v13  ;;  %v1099_v15 = vld [vmem:[%s1749_s9 + $0x28] sm:$0xf]  ;;  %v1101_v16 = vld [vmem:[%s1749_s9 + $0x2c] sm:$0xf] }
 0x2e8   : >> { %1098 = vst [vmem:[%s1745_s27 + $0x24] sm:$0xf] %v1097_v14  ;;  %1100 = vst [vmem:[%s1745_s27 + $0x28] sm:$0xf] %v1099_v15  ;;  %v1103_v17 = vld [vmem:[%s1749_s9 + $0x30] sm:$0xf] }
 0x2e9   : >> { %1102 = vst [vmem:[%s1745_s27 + $0x2c] sm:$0xf] %v1101_v16  ;;  %v1105_v18 = vld [vmem:[%s1749_s9 + $0x34] sm:$0xf]  ;;  %v1107_v19 = vld [vmem:[%s1749_s9 + $0x38] sm:$0xf] }
 0x2ea   : >> { %1104 = vst [vmem:[%s1745_s27 + $0x30] sm:$0xf] %v1103_v17  ;;  %1106 = vst [vmem:[%s1745_s27 + $0x34] sm:$0xf] %v1105_v18  ;;  %v1109_v20 = vld [vmem:[%s1749_s9 + $0x3c] sm:$0xf] }
 0x2eb   : >> { %1108 = vst [vmem:[%s1745_s27 + $0x38] sm:$0xf] %v1107_v19  ;;  %1110 = vst [vmem:[%s1745_s27 + $0x3c] sm:$0xf] %v1109_v20  ;;  %s2127_s20 = smov (%p1112_p11, %s1111_s20), 0  ;;  %s1073_s19 = sadd.s32 1, %s1757_s19  }
 0x2ec   : >> { %s1379_s21 = sshll.u32 %s2127_s20, 6  ;;  %p1072_p12 = scmp.ge.s32.totalorder %s1073_s19, %s2019_s18 }
 0x2ed   : >> { %s1116_s9 = scalar_lea.vmem %s1985_s24, %s1379_s21 [#allocation2]   ;;  %s1117_s27 = scalar_lea.vmem %s2013_s16, %s1379_s21  }
 0x2ee   : >> { %s2120_s12 = smov %s2127_s20  ;;  %1075 = sbr.rel (!%p1072_p12) target bundleno = 737 (0x2e1), region = 134 }
 0x2f5 PF: > { %s2091_s22 = sand.u32 15, %s2125_s11   ;;  %s1406_s23 = sshll.u32 %s2019_s18, 6 }
 0x2f6   : > { %s1122_s26 = scalar_lea.vmem %s1985_s24, %s1406_s23 [#allocation2]   ;;  %s1124_s29 = scalar_lea.vmem %s2013_s16, %s1406_s23  }
 0x2f7   : > { %p1384_p13 = scmp.le.s32.totalorder %s2091_s22, 0 }
 0x2f8   : > { %s1759_s30 = smov (!%p1384_p13), %s1124_s29   ;;  %s1763_s10 = smov (!%p1384_p13), %s1122_s26  }
 0x2f9   : > { %1290 = sbr.rel (%p1384_p13) target bundleno = 778 (0x30a), region = 139  ;;  %s1767_s13 = smov (!%p1384_p13), 0  }
 0x2fa   : > { %s1771_s14 = smov (!%p1384_p13), 0  }
 0x300 LB: >> { %v1134_v21 = vld [vmem:[%s1765_s10] sm:$0xf]  ;;  %s1136_s11 = sadd.s32 1, %s1769_s13  ;;  %s1128_s14 = sadd.s32 1, %s1773_s14   ;;  %s1773_s14 = sphi %s1771_s14, %s1128_s14   ;;  %s1769_s13 = sphi %s1767_s13, %s1768_s13   ;;  %s1765_s10 = sphi %s1763_s10, %s1141_s10   ;;  %s1761_s30 = sphi %s1759_s30, %s1142_s30  }
 0x301   : >> { %1135 = vst [vmem:[%s1761_s30] sm:$0xf] %v1134_v21  ;;  %p1137_p0 = scmp.ge.s32.totalorder %s1136_s11, %s2091_s22  ;;  %p1127_p1 = scmp.ge.s32.totalorder %s1128_s14, %s2091_s22 }
 0x303   : >> { %s2129_s11 = smov (%p1137_p0, %s1136_s11), 0  ;;  %1130 = sbr.rel (!%p1127_p1) target bundleno = 768 (0x300), region = 145 }
 0x304   : >> { %s1385_s24 = sshll.u32 %s2129_s11, 2  ;;  %s1768_s13 = smov %s2129_s11  }
 0x305   : >> { %s1141_s10 = scalar_lea.vmem %s1122_s26, %s1385_s24 [#allocation2]   ;;  %s1142_s30 = scalar_lea.vmem %s1124_s29, %s1385_s24  }
 0x30a PF: > { %p14_p2 = scmp.ge.s32.totalorder %s1830_s28, 4   ;;  %s2121_s24 = smov %s1737_s25 }
 0x30b   : > { %s2122_s25 = smov %s1838_s8  ;;  %s2123_s26 = smov %s1830_s28 }
 0x30c   :  { %16 = sbr.rel (!%p14_p2) target bundleno = 2 (0x2), region = 156 }

</bundles_post_ra>
